<compile_context>
chip_gen: v7x
topology: tpu7x:2x2x1
jax: 0.10.0
libtpu: 0.0.40
codegen_flags: <defaults>
</compile_context>

<pallas_src>
import jax
import jax.numpy as jnp
from jax.experimental import pallas as pl
from jax.experimental.pallas import tpu as pltpu


def _round_up(x, m):
    return ((x + m - 1) // m) * m


def classifier_kernel(x_ref,
                      wih0_ref, b0_ref,
                      wih1_ref, b1_ref,
                      fc1w_ref, fc1b_ref,
                      fc2w_ref, fc2b_ref,
                      fc3w_ref, fc3b_ref,
                      out_ref):
    # x arrives f32; cast to bf16 on the (otherwise idle) VPU for the MXU.
    x = x_ref[...].astype(jnp.bfloat16)

    # --- 2-layer tanh RNN, single time step, zero initial hidden state ---
    h1 = jnp.tanh(
        jnp.dot(x, wih0_ref[...], preferred_element_type=jnp.float32)
        + b0_ref[...])
    h2 = jnp.tanh(
        jnp.dot(h1.astype(jnp.bfloat16), wih1_ref[...],
                preferred_element_type=jnp.float32)
        + b1_ref[...])

    # --- fc head (BatchNorm already folded into fc1 weights/bias) ---
    z = jnp.dot(h2.astype(jnp.bfloat16), fc1w_ref[...],
                preferred_element_type=jnp.float32) + fc1b_ref[...]
    z = jnp.maximum(z, 0.0)                       # ReLU (dropout = identity)
    z = jnp.dot(z.astype(jnp.bfloat16), fc2w_ref[...],
                preferred_element_type=jnp.float32) + fc2b_ref[...]
    z = jnp.maximum(z, 0.0)

    # fc3 (16 -> 1), computed transposed so the batch lands on the lane axis:
    #   (1, 16) @ (tile_b, 16)^T -> (1, tile_b)  => lane-dense output store.
    logits = jnp.dot(fc3w_ref[...], z.T,
                     preferred_element_type=jnp.float32) + fc3b_ref[...]

    # Exact sigmoid: exp rides the EUP, the divide on (1, tile_b) is negligible.
    out_ref[...] = (1.0 / (1.0 + jnp.exp(-logits))).astype(out_ref.dtype)


def rnn_binary_classifier(x, kparams, *, tile_b=1024):
    """x: (B, input_dim) float array.  kparams: output of prepare_kernel_params."""
    B, input_dim = x.shape
    hidden_dim = kparams["w_ih0"].shape[1]

    if B <= 16:
        tile_b = _round_up(B, 8)
    else:
        # Rows a multiple of 16 (bf16 sublane packing); cap so the grid has
        # at least 2 steps -> both v7x TensorCores get work.
        tile_b = max(16, min(tile_b, _round_up(pl.cdiv(B, 2), 16)))
    num_tiles = pl.cdiv(B, tile_b)

    operands = (
        x.astype(jnp.float32),              # no-op when x is already f32
        kparams["w_ih0"], kparams["b0"],
        kparams["w_ih1"], kparams["b1"],
        kparams["fc1_w"], kparams["fc1_b"],
        kparams["fc2_w"], kparams["fc2_b"],
        kparams["fc3_w"], kparams["fc3_b"],
    )

    in_specs = [pl.BlockSpec((tile_b, input_dim), lambda i: (i, 0))]
    # Weights / biases: full block, constant index_map -> resident in VMEM.
    in_specs += [pl.BlockSpec(op.shape, lambda i: (0, 0)) for op in operands[1:]]

    # Lane-dense output: (num_tiles, 1, tile_b), one (1, tile_b) row per tile.
    out_specs = pl.BlockSpec((None, 1, tile_b), lambda i: (i, 0, 0))

    flops = 2 * B * (input_dim * hidden_dim + hidden_dim * hidden_dim
                     + hidden_dim * 64 + 64 * 16 + 16)
    transcendentals = B * (2 * hidden_dim + 1)       # 2 tanh layers + sigmoid exp
    bytes_accessed = (sum(int(op.size) * op.dtype.itemsize for op in operands)
                      + num_tiles * tile_b * 4)

    out = pl.pallas_call(
        classifier_kernel,
        out_shape=jax.ShapeDtypeStruct((num_tiles, 1, tile_b), jnp.float32),
        grid=(num_tiles,),
        in_specs=in_specs,
        out_specs=out_specs,
        compiler_params=pltpu.CompilerParams(
            dimension_semantics=("parallel",)),
        cost_estimate=pl.CostEstimate(flops=flops,
                                      transcendentals=transcendentals,
                                      bytes_accessed=bytes_accessed),
    )(*operands)
    return out.reshape(num_tiles * tile_b, 1)[:B]


def init_params(key, input_dim, hidden_dim=128):
    """Deterministic PyTorch-style init. Weights stored (in, out), all f32."""
    ks = list(jax.random.split(key, 16))

    def uniform(k, shape, fan):
        bound = 1.0 / jnp.sqrt(fan)
        return jax.random.uniform(k, shape, jnp.float32, -bound, bound)

    # RNN layer 0 / 1 (weights pre-transposed to (in, out))
    w_ih0 = uniform(ks[0], (input_dim, hidden_dim), hidden_dim)
    b_ih0 = uniform(ks[1], (1, hidden_dim), hidden_dim)
    b_hh0 = uniform(ks[2], (1, hidden_dim), hidden_dim)
    w_ih1 = uniform(ks[3], (hidden_dim, hidden_dim), hidden_dim)
    b_ih1 = uniform(ks[4], (1, hidden_dim), hidden_dim)
    b_hh1 = uniform(ks[5], (1, hidden_dim), hidden_dim)

    # fc head
    fc1_w = uniform(ks[6], (hidden_dim, 64), hidden_dim)
    fc1_b = uniform(ks[7], (1, 64), hidden_dim)
    fc2_w = uniform(ks[8], (64, 16), 64)
    fc2_b = uniform(ks[9], (1, 16), 64)
    fc3_w = uniform(ks[10], (16, 1), 16)
    fc3_b = uniform(ks[11], (1, 1), 16)

    # BatchNorm1d(64) eval mode: gamma=1, beta=0, running_mean=0, running_var=1
    eps = 1e-5
    gamma = jnp.ones((1, 64), jnp.float32)
    beta = jnp.zeros((1, 64), jnp.float32)
    running_mean = jnp.zeros((1, 64), jnp.float32)
    running_var = jnp.ones((1, 64), jnp.float32)
    bn_scale = gamma / jnp.sqrt(running_var + eps)
    bn_shift = beta - running_mean * bn_scale

    return {
        "w_ih0": w_ih0, "b0": b_ih0 + b_hh0,
        "w_ih1": w_ih1, "b1": b_ih1 + b_hh1,
        "fc1_w": fc1_w, "fc1_b": fc1_b,
        "bn_scale": bn_scale, "bn_shift": bn_shift,
        "fc2_w": fc2_w, "fc2_b": fc2_b,
        "fc3_w": fc3_w, "fc3_b": fc3_b,
    }


def prepare_kernel_params(p):
    """One-time host-side prep: fold BN into fc1, cast matmul weights to bf16,
    reshape fc3 weight to a (1, 16) row for the transposed in-kernel dot."""
    fc1_w = (p["fc1_w"] * p["bn_scale"]).astype(jnp.bfloat16)
    fc1_b = p["fc1_b"] * p["bn_scale"] + p["bn_shift"]
    return {
        "w_ih0": p["w_ih0"].astype(jnp.bfloat16), "b0": p["b0"],
        "w_ih1": p["w_ih1"].astype(jnp.bfloat16), "b1": p["b1"],
        "fc1_w": fc1_w, "fc1_b": fc1_b,
        "fc2_w": p["fc2_w"].astype(jnp.bfloat16), "fc2_b": p["fc2_b"],
        "fc3_w": p["fc3_w"].reshape(1, 16), "fc3_b": p["fc3_b"],
    }


def reference_forward(x, p):
    """Pure-JAX f32 reference of the original module (inference mode)."""
    h1 = jnp.tanh(x @ p["w_ih0"] + p["b0"])
    h2 = jnp.tanh(h1 @ p["w_ih1"] + p["b1"])
    z = h2 @ p["fc1_w"] + p["fc1_b"]
    z = z * p["bn_scale"] + p["bn_shift"]
    z = jnp.maximum(z, 0.0)
    z = jnp.maximum(z @ p["fc2_w"] + p["fc2_b"], 0.0)
    z = z @ p["fc3_w"] + p["fc3_b"]
    return jax.nn.sigmoid(z)


if __name__ == "__main__":
    key = jax.random.PRNGKey(0)
    k_x, k_p = jax.random.split(key)

    B, INPUT_DIM, HIDDEN_DIM = 8, 256, 128
    x = jax.random.normal(k_x, (B, INPUT_DIM), jnp.float32)
    params = init_params(k_p, INPUT_DIM, HIDDEN_DIM)
    kparams = prepare_kernel_params(params)

    out = rnn_binary_classifier(x, kparams)
    out = jax.block_until_ready(out)

    ref = reference_forward(x, params)
    assert out.shape == (B, 1), out.shape
    # bf16 matmul operands -> loosened tolerance vs f32 reference.
    assert jnp.allclose(out, ref, atol=3e-2, rtol=3e-2), (out, ref)

    print("KERNEL_OK")
</pallas_src>

<mosaic_0001>
module attributes {stable_mosaic.version = 11 : i64} {
  func.func @classifier_kernel(%arg0: i32, %arg1: memref<8x256xf32, #tpu.memory_space<vmem>>, %arg2: memref<256x128xbf16, #tpu.memory_space<vmem>>, %arg3: memref<1x128xf32, #tpu.memory_space<vmem>>, %arg4: memref<128x128xbf16, #tpu.memory_space<vmem>>, %arg5: memref<1x128xf32, #tpu.memory_space<vmem>>, %arg6: memref<128x64xbf16, #tpu.memory_space<vmem>>, %arg7: memref<1x64xf32, #tpu.memory_space<vmem>>, %arg8: memref<64x16xbf16, #tpu.memory_space<vmem>>, %arg9: memref<1x16xf32, #tpu.memory_space<vmem>>, %arg10: memref<1x16xf32, #tpu.memory_space<vmem>>, %arg11: memref<1x1xf32, #tpu.memory_space<vmem>>, %arg12: memref<1x1x8xf32, #tpu.memory_space<vmem>>) attributes {dimension_semantics = [#tpu.dimension_semantics<parallel>], iteration_bounds = array<i64: 1>, scalar_prefetch = 0 : i64, scratch_operands = 0 : i64, tpu.core_type = #tpu.core_type<tc>, window_params = [{transform_indices = @transform_0, window_bounds = array<i64: 8, 256>}, {pipeline_mode = #tpu.pipeline_mode<synchronous>, transform_indices = @transform_1, window_bounds = array<i64: 256, 128>}, {pipeline_mode = #tpu.pipeline_mode<synchronous>, transform_indices = @transform_2, window_bounds = array<i64: 1, 128>}, {pipeline_mode = #tpu.pipeline_mode<synchronous>, transform_indices = @transform_3, window_bounds = array<i64: 128, 128>}, {pipeline_mode = #tpu.pipeline_mode<synchronous>, transform_indices = @transform_4, window_bounds = array<i64: 1, 128>}, {pipeline_mode = #tpu.pipeline_mode<synchronous>, transform_indices = @transform_5, window_bounds = array<i64: 128, 64>}, {pipeline_mode = #tpu.pipeline_mode<synchronous>, transform_indices = @transform_6, window_bounds = array<i64: 1, 64>}, {pipeline_mode = #tpu.pipeline_mode<synchronous>, transform_indices = @transform_7, window_bounds = array<i64: 64, 16>}, {pipeline_mode = #tpu.pipeline_mode<synchronous>, transform_indices = @transform_8, window_bounds = array<i64: 1, 16>}, {pipeline_mode = #tpu.pipeline_mode<synchronous>, transform_indices = @transform_9, window_bounds = array<i64: 1, 16>}, {pipeline_mode = #tpu.pipeline_mode<synchronous>, transform_indices = @transform_10, window_bounds = array<i64: 1, 1>}, {transform_indices = @transform_11, window_bounds = array<i64: 1, 1, 8>}]} {
    %c0 = arith.constant 0 : index
    %c0_0 = arith.constant 0 : index
    %0 = vector.load %arg1[%c0, %c0_0] : memref<8x256xf32, #tpu.memory_space<vmem>>, vector<8x256xf32>
    %1 = arith.truncf %0 : vector<8x256xf32> to vector<8x256xbf16>
    %c0_1 = arith.constant 0 : index
    %c0_2 = arith.constant 0 : index
    %2 = vector.load %arg2[%c0_1, %c0_2] : memref<256x128xbf16, #tpu.memory_space<vmem>>, vector<256x128xbf16>
    %cst = arith.constant dense<0.000000e+00> : vector<8x128xf32>
    %3 = tpu.matmul %1, %2, %cst {dimension_numbers = #tpu.dot_dimension_numbers<[1], [0], [0], [1], [0, 0, 1, 1], [], []>} : vector<8x256xbf16>, vector<256x128xbf16>, vector<8x128xf32> -> vector<8x128xf32>
    %c0_3 = arith.constant 0 : index
    %c0_4 = arith.constant 0 : index
    %4 = vector.load %arg3[%c0_3, %c0_4] : memref<1x128xf32, #tpu.memory_space<vmem>>, vector<1x128xf32>
    %5 = vector.broadcast %4 : vector<1x128xf32> to vector<8x128xf32>
    %6 = arith.addf %3, %5 : vector<8x128xf32>
    %7 = math.tanh %6 : vector<8x128xf32>
    %8 = arith.truncf %7 : vector<8x128xf32> to vector<8x128xbf16>
    %c0_5 = arith.constant 0 : index
    %c0_6 = arith.constant 0 : index
    %9 = vector.load %arg4[%c0_5, %c0_6] : memref<128x128xbf16, #tpu.memory_space<vmem>>, vector<128x128xbf16>
    %cst_7 = arith.constant dense<0.000000e+00> : vector<8x128xf32>
    %10 = tpu.matmul %8, %9, %cst_7 {dimension_numbers = #tpu.dot_dimension_numbers<[1], [0], [0], [1], [0, 0, 1, 1], [], []>} : vector<8x128xbf16>, vector<128x128xbf16>, vector<8x128xf32> -> vector<8x128xf32>
    %c0_8 = arith.constant 0 : index
    %c0_9 = arith.constant 0 : index
    %11 = vector.load %arg5[%c0_8, %c0_9] : memref<1x128xf32, #tpu.memory_space<vmem>>, vector<1x128xf32>
    %12 = vector.broadcast %11 : vector<1x128xf32> to vector<8x128xf32>
    %13 = arith.addf %10, %12 : vector<8x128xf32>
    %14 = math.tanh %13 : vector<8x128xf32>
    %15 = arith.truncf %14 : vector<8x128xf32> to vector<8x128xbf16>
    %c0_10 = arith.constant 0 : index
    %c0_11 = arith.constant 0 : index
    %16 = vector.load %arg6[%c0_10, %c0_11] : memref<128x64xbf16, #tpu.memory_space<vmem>>, vector<128x64xbf16>
    %cst_12 = arith.constant dense<0.000000e+00> : vector<8x64xf32>
    %17 = tpu.matmul %15, %16, %cst_12 {dimension_numbers = #tpu.dot_dimension_numbers<[1], [0], [0], [1], [0, 0, 1, 1], [], []>} : vector<8x128xbf16>, vector<128x64xbf16>, vector<8x64xf32> -> vector<8x64xf32>
    %c0_13 = arith.constant 0 : index
    %c0_14 = arith.constant 0 : index
    %18 = vector.load %arg7[%c0_13, %c0_14] : memref<1x64xf32, #tpu.memory_space<vmem>>, vector<1x64xf32>
    %19 = vector.broadcast %18 : vector<1x64xf32> to vector<8x64xf32>
    %20 = arith.addf %17, %19 : vector<8x64xf32>
    %cst_15 = arith.constant 0.000000e+00 : f32
    %21 = vector.broadcast %cst_15 : f32 to vector<8x64xf32>
    %22 = arith.maximumf %20, %21 : vector<8x64xf32>
    %23 = arith.truncf %22 : vector<8x64xf32> to vector<8x64xbf16>
    %c0_16 = arith.constant 0 : index
    %c0_17 = arith.constant 0 : index
    %24 = vector.load %arg8[%c0_16, %c0_17] : memref<64x16xbf16, #tpu.memory_space<vmem>>, vector<64x16xbf16>
    %cst_18 = arith.constant dense<0.000000e+00> : vector<8x16xf32>
    %25 = tpu.matmul %23, %24, %cst_18 {dimension_numbers = #tpu.dot_dimension_numbers<[1], [0], [0], [1], [0, 0, 1, 1], [], []>} : vector<8x64xbf16>, vector<64x16xbf16>, vector<8x16xf32> -> vector<8x16xf32>
    %c0_19 = arith.constant 0 : index
    %c0_20 = arith.constant 0 : index
    %26 = vector.load %arg9[%c0_19, %c0_20] : memref<1x16xf32, #tpu.memory_space<vmem>>, vector<1x16xf32>
    %27 = vector.broadcast %26 : vector<1x16xf32> to vector<8x16xf32>
    %28 = arith.addf %25, %27 : vector<8x16xf32>
    %cst_21 = arith.constant 0.000000e+00 : f32
    %29 = vector.broadcast %cst_21 : f32 to vector<8x16xf32>
    %30 = arith.maximumf %28, %29 : vector<8x16xf32>
    %c0_22 = arith.constant 0 : index
    %c0_23 = arith.constant 0 : index
    %31 = vector.load %arg10[%c0_22, %c0_23] : memref<1x16xf32, #tpu.memory_space<vmem>>, vector<1x16xf32>
    %32 = tpu.transpose %30, [1, 0] : vector<8x16xf32> -> vector<16x8xf32>
    %cst_24 = arith.constant dense<0.000000e+00> : vector<1x8xf32>
    %33 = tpu.matmul %31, %32, %cst_24 {dimension_numbers = #tpu.dot_dimension_numbers<[1], [0], [0], [1], [0, 0, 1, 1], [], []>} : vector<1x16xf32>, vector<16x8xf32>, vector<1x8xf32> -> vector<1x8xf32>
    %c0_25 = arith.constant 0 : index
    %c0_26 = arith.constant 0 : index
    %34 = vector.load %arg11[%c0_25, %c0_26] : memref<1x1xf32, #tpu.memory_space<vmem>>, vector<1x1xf32>
    %35 = vector.broadcast %34 : vector<1x1xf32> to vector<1x8xf32>
    %36 = arith.addf %33, %35 : vector<1x8xf32>
    %cst_27 = arith.constant 0.000000e+00 : f32
    %37 = vector.broadcast %cst_27 : f32 to vector<1x8xf32>
    %38 = arith.subf %37, %36 : vector<1x8xf32>
    %39 = math.exp %38 : vector<1x8xf32>
    %cst_28 = arith.constant 1.000000e+00 : f32
    %40 = vector.broadcast %cst_28 : f32 to vector<1x8xf32>
    %41 = arith.addf %40, %39 : vector<1x8xf32>
    %cst_29 = arith.constant 1.000000e+00 : f32
    %42 = vector.broadcast %cst_29 : f32 to vector<1x8xf32>
    %43 = arith.divf %42, %41 : vector<1x8xf32>
    %c0_30 = arith.constant 0 : index
    %c0_31 = arith.constant 0 : index
    %c0_32 = arith.constant 0 : index
    %44 = vector.load %arg12[%c0_30, %c0_31, %c0_32] : memref<1x1x8xf32, #tpu.memory_space<vmem>>, vector<1x1x8xf32>
    %45 = vector.shape_cast %44 : vector<1x1x8xf32> to vector<1x8xf32>
    %46 = vector.shape_cast %43 : vector<1x8xf32> to vector<1x1x8xf32>
    tpu.vector_store %arg12[%c0_30, %c0_31, %c0_32], %46 {strides = array<i32>} : memref<1x1x8xf32, #tpu.memory_space<vmem>>, vector<1x1x8xf32>,
    return
  }
  func.func @transform_0(%arg0: i32) -> (i32, i32) {
    %c0_i32 = arith.constant 0 : i32
    %c0_i32_0 = arith.constant 0 : i32
    return %arg0, %c0_i32 : i32, i32
  }
  func.func @transform_1(%arg0: i32) -> (i32, i32) {
    %c0_i32 = arith.constant 0 : i32
    %c0_i32_0 = arith.constant 0 : i32
    %c0_i32_1 = arith.constant 0 : i32
    return %c0_i32, %c0_i32_0 : i32, i32
  }
  func.func @transform_2(%arg0: i32) -> (i32, i32) {
    %c0_i32 = arith.constant 0 : i32
    %c0_i32_0 = arith.constant 0 : i32
    %c0_i32_1 = arith.constant 0 : i32
    return %c0_i32, %c0_i32_0 : i32, i32
  }
  func.func @transform_3(%arg0: i32) -> (i32, i32) {
    %c0_i32 = arith.constant 0 : i32
    %c0_i32_0 = arith.constant 0 : i32
    %c0_i32_1 = arith.constant 0 : i32
    return %c0_i32, %c0_i32_0 : i32, i32
  }
  func.func @transform_4(%arg0: i32) -> (i32, i32) {
    %c0_i32 = arith.constant 0 : i32
    %c0_i32_0 = arith.constant 0 : i32
    %c0_i32_1 = arith.constant 0 : i32
    return %c0_i32, %c0_i32_0 : i32, i32
  }
  func.func @transform_5(%arg0: i32) -> (i32, i32) {
    %c0_i32 = arith.constant 0 : i32
    %c0_i32_0 = arith.constant 0 : i32
    %c0_i32_1 = arith.constant 0 : i32
    return %c0_i32, %c0_i32_0 : i32, i32
  }
  func.func @transform_6(%arg0: i32) -> (i32, i32) {
    %c0_i32 = arith.constant 0 : i32
    %c0_i32_0 = arith.constant 0 : i32
    %c0_i32_1 = arith.constant 0 : i32
    return %c0_i32, %c0_i32_0 : i32, i32
  }
  func.func @transform_7(%arg0: i32) -> (i32, i32) {
    %c0_i32 = arith.constant 0 : i32
    %c0_i32_0 = arith.constant 0 : i32
    %c0_i32_1 = arith.constant 0 : i32
    return %c0_i32, %c0_i32_0 : i32, i32
  }
  func.func @transform_8(%arg0: i32) -> (i32, i32) {
    %c0_i32 = arith.constant 0 : i32
    %c0_i32_0 = arith.constant 0 : i32
    %c0_i32_1 = arith.constant 0 : i32
    return %c0_i32, %c0_i32_0 : i32, i32
  }
  func.func @transform_9(%arg0: i32) -> (i32, i32) {
    %c0_i32 = arith.constant 0 : i32
    %c0_i32_0 = arith.constant 0 : i32
    %c0_i32_1 = arith.constant 0 : i32
    return %c0_i32, %c0_i32_0 : i32, i32
  }
  func.func @transform_10(%arg0: i32) -> (i32, i32) {
    %c0_i32 = arith.constant 0 : i32
    %c0_i32_0 = arith.constant 0 : i32
    %c0_i32_1 = arith.constant 0 : i32
    return %c0_i32, %c0_i32_0 : i32, i32
  }
  func.func @transform_11(%arg0: i32) -> (i32, i32, i32) {
    %c0_i32 = arith.constant 0 : i32
    %c0_i32_0 = arith.constant 0 : i32
    %c0_i32_1 = arith.constant 0 : i32
    return %arg0, %c0_i32, %c0_i32_0 : i32, i32, i32
  }
}

</mosaic_0001>

<bundles_post_ra>
// kernel: tpu_custom_call.1
= control target key start
LH: loop header
LB: loop body
LE: loop exit
PB: predicated region body
PF: predicated region fallthrough
CT: control target
= control target key end

     0   :  { %s1185_s0 = inlined_call_operand.hbm [shape: f32[8,256], index: 0, kind: input, shape index: {}]   ;;  %s1186_s1 = inlined_call_operand.vmem [shape: bf16[256,128], index: 1, kind: input, shape index: {}]   ;;  %s1187_s2 = inlined_call_operand.vmem [shape: f32[1,128], index: 2, kind: input, shape index: {}]   ;;  %s1188_s3 = inlined_call_operand.hbm [shape: bf16[128,128], index: 3, kind: input, shape index: {}]   ;;  %s1189_s4 = inlined_call_operand.vmem [shape: f32[1,128], index: 4, kind: input, shape index: {}]   ;;  %s1190_s5 = inlined_call_operand.vmem [shape: bf16[128,64], index: 5, kind: input, shape index: {}]   ;;  %s1191_s6 = inlined_call_operand.vmem [shape: f32[1,64], index: 6, kind: input, shape index: {}]   ;;  %s1192_s7 = inlined_call_operand.vmem [shape: bf16[64,16], index: 7, kind: input, shape index: {}]   ;;  %s1193_s8 = inlined_call_operand.vmem [shape: f32[1,16], index: 8, kind: input, shape index: {}]   ;;  %s1194_s9 = inlined_call_operand.vmem [shape: f32[1,16], index: 9, kind: input, shape index: {}]   ;;  %s1195_s10 = inlined_call_operand.<no memory space> [shape: f32[1,1], index: 10, kind: input, shape index: {}]   ;;  %s1196_s11 = inlined_call_operand.hbm [shape: f32[1,1,8], index: 11, kind: output, shape index: {}]  }
   0x1   :  { %v16_v0 = vstv %s1195_s10 }
   0x2   :  { %17 = vst [vmem:[#allocation2] sm:$0x1] %v16_v0 }
   0x3   :  { %18 = vsyncpa [#allocation4], 0 }
   0x4   :  { %19 = vsyncpa [#allocation7], 0 }
   0x5   :  { %20 = vsyncpa [#allocation5], 0  ;;  %s943_s19 = smov [#allocation3]   ;;  %s944_s21 = smov [#allocation6]  }
   0x6   :  { %s27_s20 = sshll.u32 %s943_s19, 4  ;;  %s40_s22 = sshll.u32 %s944_s21, 4  ;;  %s28_s20 = int_to_ptr.vmem [resolvable:$true] %s27_s20  ;;  %s1014_s22 = int_to_ptr.vmem [resolvable:$true] %s40_s22 }
   0x7   :  { %s871_s25 = scalar_lea.hbm %s1185_s0, 256 }
   0x8   :  { %p872_p0 = scmp.ne.s32.totalorder %s1185_s0, %s871_s25  ;;  %p875_p1 = scmp.lt.u32.totalorder %s871_s25, %s1185_s0 }
   0xa   :  { %p877_p2 = pnand %p875_p1, %p872_p0 }
   0xc   :  { %880 = shalt.err (!%p877_p2)
}
   0xd   :  { %s881_s29 = scalar_lea.vmem %s28_s20, 256  ;;  %p886_p4 = scmp.lt.s32.totalorder %s28_s20, %s28_s20 }
   0xe   :  { %p882_p3 = scmp.ne.s32.totalorder %s28_s20, %s881_s29  ;;  %p887_p5 = scmp.lt.s32.totalorder %s881_s29, %s881_s29 }
  0x10   :  { %p888_p6 = por %p887_p5, %p886_p4 }
  0x12   :  { %p889_p7 = pnand %p888_p6, %p882_p3 }
  0x14   :  { %892 = shalt.err (!%p889_p7)
}
  0x15   :  { %30 = dma.hbm_to_vmem [thread:$0]  %s1185_s0, 256, %s28_s20, [#allocation4]  }
  0x16   :  { %s893_s15 = scalar_lea.hbm %s1188_s3, 1024 }
  0x17   :  { %p894_p8 = scmp.ne.s32.totalorder %s1188_s3, %s893_s15  ;;  %p897_p9 = scmp.lt.u32.totalorder %s893_s15, %s1188_s3 }
  0x19   :  { %p899_p10 = pnand %p897_p9, %p894_p8 }
  0x1b   :  { %902 = shalt.err (!%p899_p10)
}
  0x1c   :  { %s903_s21 = scalar_lea.vmem %s1014_s22, 1024  ;;  %p908_p12 = scmp.lt.s32.totalorder %s1014_s22, %s1014_s22 }
  0x1d   :  { %p904_p11 = scmp.ne.s32.totalorder %s1014_s22, %s903_s21  ;;  %p909_p13 = scmp.lt.s32.totalorder %s903_s21, %s903_s21 }
  0x1f   :  { %p910_p0 = por %p909_p13, %p908_p12 }
  0x21   :  { %p911_p1 = pnand %p910_p0, %p904_p11 }
  0x23   :  { %914 = shalt.err (!%p911_p1)
}
  0x24   :  { %s945_s0 = smov 64   ;;  %s946_s20 = smov 4  }
  0x25   :  { %46 = dma.hbm_to_vmem [thread:$0]  %s1188_s3, 1024, %s1014_s22, [#allocation7], %s945_s0, %s945_s0, %s946_s20  }
  0x26   :  { %937 = dma.done.wait [#allocation4], 256  }
  0x27   :  { %938 = vsyncadd [#allocation4], 4294967040 }
  0x28   :  { %939 = dma.done.wait [#allocation7], 1024  }
  0x29   :  { %940 = vsyncadd [#allocation7], 4294966272  ;;  %v947_v1 = vmov 0.0   ;;  %v827_v2 = vld [vmem:[%s1186_s1 + $0x40] sm:$0xff]   ;;  %v829_v4 = vld [vmem:[%s1186_s1 + $0x48] sm:$0xff]   ;;  %vm948_vm0 = vmmov 0  }
  0x2a   :  { %761 = vmatprep.subr.bf16.mxu1 %v947_v1  ;;  %v828_v3 = vld [vmem:[%s1186_s1] sm:$0xff]   ;;  %714 = vmatprep.subr.bf16.mxu0 %v827_v2  ;;  %v830_v5 = vld [vmem:[%s1186_s1 + $0x8] sm:$0xff]   ;;  %v831_v6 = vld [vmem:[%s1186_s1 + $0x50] sm:$0xff]   ;;  %vm514_vm1 = vcmask 523264   ;;  %vm570_vm2 = vcmask 130048   ;;  %vm653_vm3 = vcmask 57344  }
  0x2b   :  { %715 = vmatpush3.bf16.msra.mxu0 %v828_v3  ;;  %v832_v7 = vld [vmem:[%s1186_s1 + $0x10] sm:$0xff]   ;;  %v833_v8 = vld [vmem:[%s1186_s1 + $0x58] sm:$0xff]   ;;  %v835_v10 = vld [vmem:[%s1186_s1 + $0x60] sm:$0xff]   ;;  %777 = vmatprep.mubr.msk.bf16.mxu1 %vm948_vm0, %v947_v1 }
  0x2c   :  { %716 = vmatprep.subr.bf16.mxu0 %v829_v4  ;;  %v834_v9 = vld [vmem:[%s1186_s1 + $0x18] sm:$0xff]   ;;  %v836_v11 = vld [vmem:[%s1186_s1 + $0x20] sm:$0xff]   ;;  %v837_v12 = vld [vmem:[%s1186_s1 + $0x68] sm:$0xff]  }
  0x2d   :  { %v69_v13 = vld [vmem:[#allocation3 + $0x8] sm:$0xff]  ;;  %v843_v16 = vld [vmem:[#allocation6] sm:$0xff]   ;;  %v844_v18 = vld [vmem:[#allocation6 + $0x8] sm:$0xff]  }
  0x2e   :  { %v838_v14 = vld [vmem:[%s1186_s1 + $0x28] sm:$0xff]   ;;  %v71_v15 = vpack.c.bf16 %v69_v13, %v69_v13  ;;  %v839_v17 = vld [vmem:[%s1186_s1 + $0x70] sm:$0xff]   ;;  %762 = vmatpush3.bf16.msra.mxu1 %v843_v16  ;;  %v841_v20 = vld [vmem:[%s1186_s1 + $0x78] sm:$0xff]   ;;  %v566_v13 = vlaneseq }
  0x2f   :  { %717 = vmatpush3.bf16.msra.mxu0 %v830_v5  ;;  %v840_v19 = vld [vmem:[%s1186_s1 + $0x30] sm:$0xff]   ;;  %763 = vmatprep.subr.bf16.mxu1 %v947_v1  ;;  %v845_v21 = vld [vmem:[#allocation6 + $0x10] sm:$0xff]   ;;  %v842_v22 = vld [vmem:[%s1186_s1 + $0x38] sm:$0xff]   ;;  %v949_v5 = vmov 0  }
  0x30   :  { %718 = vmatprep.subr.bf16.mxu0 %v831_v6  ;;  %239 = vmatprep.mubr.bf16.mxu0 %v71_v15  ;;  %v68_v23 = vld [vmem:[#allocation3] sm:$0xff]  ;;  %v846_v25 = vld [vmem:[#allocation6 + $0x18] sm:$0xff]   ;;  %v847_v26 = vld [vmem:[#allocation6 + $0x20] sm:$0xff]  }
  0x31   :  { %v70_v24 = vpack.c.bf16 %v68_v23, %v68_v23  ;;  %v848_v27 = vld [vmem:[#allocation6 + $0x28] sm:$0xff]   ;;  %v849_v28 = vld [vmem:[#allocation6 + $0x30] sm:$0xff]   ;;  %v850_v29 = vld [vmem:[#allocation6 + $0x38] sm:$0xff]   ;;  %826 = vset.pattern.permute.xlu0 %v949_v5 }
  0x32   :  { %764 = vmatpush3.bf16.msra.mxu1 %v844_v18  ;;  %v851_v30 = vld [vmem:[%s1190_s5] sm:$0xff]   ;;  %v852_v31 = vld [vmem:[%s1190_s5 + $0x8] sm:$0xff]   ;;  %v853_v32 = vld [vmem:[%s1190_s5 + $0x10] sm:$0xff]  }
  0x33   :  { %719 = vmatpush3.bf16.msra.mxu0 %v832_v7  ;;  %765 = vmatprep.subr.bf16.mxu1 %v947_v1  ;;  %v854_v33 = vld [vmem:[%s1190_s5 + $0x18] sm:$0xff]   ;;  %v671_v35 = vld [vmem:[%s1187_s2] ss:$0 sm:$0xff]  ;;  %v856_v44 = vld [vmem:[%s1190_s5 + $0x28] sm:$0xff]  }
  0x34   :  { %720 = vmatprep.subr.bf16.mxu0 %v833_v8  ;;  %v855_v43 = vld [vmem:[%s1190_s5 + $0x20] sm:$0xff]   ;;  %v857_v45 = vld [vmem:[%s1190_s5 + $0x30] sm:$0xff]   ;;  %v858_v46 = vld [vmem:[%s1190_s5 + $0x38] sm:$0xff]  }
  0x35   :  { %v859_v47 = vld [vmem:[%s1192_s7] sm:$0xff]   ;;  %v860_v48 = vld [vmem:[%s1192_s7 + $0x8] sm:$0xff]   ;;  %v861_v57 = vld [vmem:[%s1192_s7 + $0x10] sm:$0xff]  }
  0x36   :  { %766 = vmatpush3.bf16.msra.mxu1 %v845_v21  ;;  %v688_v49 = vld [vmem:[%s1189_s4] ss:$0 sm:$0xff]  ;;  %v862_v58 = vld [vmem:[%s1192_s7 + $0x18] sm:$0xff]  }
  0x37   :  { %721 = vmatpush3.bf16.msra.mxu0 %v834_v9  ;;  %767 = vmatprep.subr.bf16.mxu1 %v947_v1  ;;  %v697_v59 = vld [vmem:[%s1191_s6] ss:$0 sm:$0xff] }
  0x38   :  { %722 = vmatprep.subr.bf16.mxu0 %v835_v10  ;;  %v560_v4 = vld [vmem:[#allocation2] sm:$0x1] }
  0x39   :  { %563 = vperm.xlu0 %826, %v560_v4   ;;  %v706_v6 = vld [vmem:[%s1193_s8] ss:$0 sm:$0xff]  ;;  %s950_s8 = smov [#allocation8]  }
  0x3a   :  { %768 = vmatpush3.bf16.msra.mxu1 %v846_v25  ;;  %s661_s18 = sshll.u32 %s950_s8, 4  ;;  %s662_s18 = int_to_ptr.vmem [resolvable:$true] %s661_s18 }
  0x3b   :  { %723 = vmatpush3.bf16.msra.mxu0 %v836_v11  ;;  %769 = vmatprep.subr.bf16.mxu1 %v947_v1  ;;  %s919_s19 = scalar_lea.vmem %s662_s18, 32  ;;  %p920_p3 = scmp.lt.s32.totalorder %s662_s18, %s662_s18 }
  0x3c   :  { %724 = vmatprep.subr.bf16.mxu0 %v837_v12 }
  0x3e   :  { %770 = vmatpush3.bf16.msra.mxu1 %v847_v26 }
  0x3f   :  { %725 = vmatpush3.bf16.msra.mxu0 %v838_v14  ;;  %771 = vmatprep.subr.bf16.mxu1 %v947_v1  ;;  %v567_v14 = vshrl.u32 %v566_v13, 7 }
  0x40   :  { %726 = vmatprep.subr.bf16.mxu0 %v839_v17 }
  0x41   :  { %v568_v15 = vsub.s32 0, %v567_v14 }
  0x42   :  { %772 = vmatpush3.bf16.msra.mxu1 %v848_v27 }
  0x43   :  { %727 = vmatpush3.bf16.msra.mxu0 %v840_v19  ;;  %773 = vmatprep.subr.bf16.mxu1 %v947_v1 }
  0x44   :  { %728 = vmatprep.subr.bf16.mxu0 %v841_v20 }
  0x46   :  { %774 = vmatpush3.bf16.msra.mxu1 %v849_v28 }
  0x47   :  { %729 = vmatpush3.bf16.msra.mxu0 %v842_v22  ;;  %775 = vmatprep.subr.bf16.mxu1 %v947_v1 }
  0x48   :  { %781 = vmatprep.subr.bf16.mxu0 %v947_v1 }
  0x4a   :  { %240 = vmatmul.mubr.bf16.vlgmr.msra.gmra.mrb[0].mxu0 %v70_v24  ;;  %776 = vmatpush3.bf16.msra.mxu1 %v850_v29 }
  0x4b   :  { %797 = vmatprep.mubr.msk.bf16.mxu0 %vm948_vm0, %v947_v1  ;;  %801 = vmatprep.subr.bf16.mxu1 %v947_v1 }
  0x4c   :  { %782 = vmatpush3.bf16.msra.mxu0 %v851_v30 }
  0x4d   :  { %783 = vmatprep.subr.bf16.mxu0 %v947_v1 }
  0x50   :  { %784 = vmatpush3.bf16.msra.mxu0 %v852_v31 }
  0x51   :  { %785 = vmatprep.subr.bf16.mxu0 %v947_v1 }
  0x54   :  { %786 = vmatpush3.bf16.msra.mxu0 %v853_v32 }
  0x55   :  { %787 = vmatprep.subr.bf16.mxu0 %v947_v1 }
  0x58   :  { %788 = vmatpush3.bf16.msra.mxu0 %v854_v33 }
  0x59   :  { %789 = vmatprep.subr.bf16.mxu0 %v947_v1 }
  0x5c   :  { %790 = vmatpush3.bf16.msra.mxu0 %v855_v43 }
  0x5d   :  { %791 = vmatprep.subr.bf16.mxu0 %v947_v1 }
  0x60   :  { %792 = vmatpush3.bf16.msra.mxu0 %v856_v44 }
  0x61   :  { %793 = vmatprep.subr.bf16.mxu0 %v947_v1 }
  0x64   :  { %794 = vmatpush3.bf16.msra.mxu0 %v857_v45 }
  0x65   :  { %795 = vmatprep.subr.bf16.mxu0 %v947_v1 }
  0x68   :  { %796 = vmatpush3.bf16.msra.mxu0 %v858_v46 }
  0xb8   :  { %v564_v16 = vpop.permute.xlu0 %563 }
  0xb9   :  { %v569_v17 = vrot.slane %v564_v16, %v568_v15 }
 0x11d   :  { %v730_v34 = vpop.f32.mrb[0].mxu0 }
 0x11e   :  { %v731_v36 = vpop.f32.mrb[1].mxu0 }
 0x11f   :  { %v732_v37 = vadd.f32 %v731_v36, %v730_v34  ;;  %v733_v38 = vpop.f32.mrb[2].mxu0 }
 0x120   :  { %v734_v39 = vpop.f32.mrb[3].mxu0 }
 0x121   :  { %v242_v40 = vadd.f32 %v732_v37, %v671_v35 }
 0x123   :  { %863 = vtanh.f32 %v242_v40 }
 0x12d   :  { %v864_v41 = vpop.eup %863 }
 0x12e   :  { %v248_v42 = vpack.c.bf16 %v864_v41, %v864_v41 }
 0x130   :  { %778 = vmatmul.mubr.bf16.vlgmr.msra.gmra.mrb[0].mxu1 %v248_v42 }
 0x131   :  { %809 = vmatprep.mubr.msk.bf16.mxu1 %vm948_vm0, %v947_v1  ;;  %802 = vmatpush3.bf16.msra.mxu1 %v859_v47 }
 0x132   :  { %803 = vmatprep.subr.bf16.mxu1 %v947_v1 }
 0x135   :  { %804 = vmatpush3.bf16.msra.mxu1 %v860_v48 }
 0x136   :  { %805 = vmatprep.subr.bf16.mxu1 %v947_v1 }
 0x139   :  { %806 = vmatpush3.bf16.msra.mxu1 %v861_v57 }
 0x13a   :  { %807 = vmatprep.subr.bf16.mxu1 %v947_v1 }
 0x13d   :  { %808 = vmatpush3.bf16.msra.mxu1 %v862_v58 }
 0x13e   :  { %813 = vmatprep.subr.mxu1 %v947_v1 }
 0x203   :  { %v354_v50 = vpop.f32.mrb[0].mxu1 }
 0x204   :  { %v355_v51 = vadd.f32 %v688_v49, %v354_v50  ;;  %v779_v52 = vpop.f32.mrb[1].mxu1 }
 0x205   :  { %v357_v53 = vpop.f32.mrb[2].mxu1 }
 0x206   :  { %865 = vtanh.f32 %v355_v51  ;;  %v780_v54 = vpop.f32.mrb[3].mxu1 }
 0x210   :  { %v866_v55 = vpop.eup %865 }
 0x211   :  { %v361_v56 = vpack.c.bf16 %v866_v55, %v866_v55 }
 0x213   :  { %798 = vmatmul.mubr.bf16.vlgmr.msra.gmra.mrb[4].mxu0 %v361_v56 }
 0x2e6   :  { %v467_v60 = vpop.f32.mrb[4].mxu0 }
 0x2e7   :  { %v468_v61 = vadd.f32 %v697_v59, %v467_v60  ;;  %v799_v62 = vpop.f32.mrb[5].mxu0 }
 0x2e8   :  { %v470_v63 = vpop.f32.mrb[6].mxu0 }
 0x2e9   :  { %v473_v0 = vmax.f32 %v468_v61, 0.0  ;;  %v800_v2 = vpop.f32.mrb[7].mxu0 }
 0x2eb   :  { %v474_v3 = vpack.c.bf16 %v473_v0, %v473_v0 }
 0x2ed   :  { %810 = vmatmul.mubr.msk.bf16.vlgmr.msra.gmra.mrb[4].mxu1 %vm514_vm1, %v474_v3 }
 0x2ee   :  { %815 = vmatprep.mubr.msk.f32.mxu1 %vm948_vm0, %v947_v1  ;;  %v559_v1 = vld [vmem:[%s1194_s9] sm:$0x1]  ;;  %s915_s9 = scalar_lea.vmem %s662_s18, 16 }
 0x2ef   :  { %p916_p2 = scmp.ne.s32.totalorder %s662_s18, %s915_s9  ;;  %p921_p4 = scmp.lt.s32.totalorder %s919_s19, %s915_s9 }
 0x2f1   :  { %p922_p5 = por %p921_p4, %p920_p3 }
 0x2f3   :  { %p923_p6 = pnand %p922_p5, %p916_p2 }
 0x3c0   :  { %v552_v7 = vpop.f32.mrb[4].mxu1 }
 0x3c1   :  { %v553_v8 = vadd.f32 %v706_v6, %v552_v7  ;;  %v811_v9 = vpop.f32.mrb[5].mxu1 }
 0x3c2   :  { %v555_v10 = vpop.f32.mrb[6].mxu1 }
 0x3c3   :  { %v558_v11 = vmax.f32 %v553_v8, 0.0  ;;  %v812_v12 = vpop.f32.mrb[7].mxu1 }
 0x3c5   :  { %814 = vmatpush3.xpose.msk.msra.mxu1 %vm570_vm2, %v558_v11 }
 0x3c8   :  { %816 = vmatmul.mubr.msk.f32.vlgmr.msra.gmra.mrb[8].mxu1 %vm570_vm2, %v559_v1 }
 0x49b   :  { %v643_v18 = vpop.f32.mrb[8].mxu1 }
 0x49c   :  { %v644_v19 = vadd.f32 %v643_v18, %v569_v17  ;;  %v817_v20 = vpop.f32.mrb[9].mxu1 }
 0x49e   :  { %v647_v21 = vsub.f32 0.0, %v644_v19 }
 0x4a0   :  { %v648_v22 = vmul.f32 1.442695, %v647_v21 }
 0x4a2   :  { %867 = vpow2.f32 %v648_v22 }
 0x4ac   :  { %v868_v23 = vpop.eup %867 }
 0x4ad   :  { %v650_v24 = vadd.f32 1.0, %v868_v23 }
 0x4af   :  { %869 = vrcp.f32 %v650_v24 }
 0x4b9   :  { %v870_v25 = vpop.eup %869 }
 0x4ba   :  { %654 = vst.msk [vmem:[#allocation8] sm:$0x1] %vm653_vm3, %v870_v25 }
 0x4bb   :  { %926 = shalt.err (!%p923_p6)
}
 0x4bc   :  { %s927_s20 = scalar_lea.hbm %s1196_s11, 16 }
 0x4bd   :  { %p928_p7 = scmp.ne.s32.totalorder %s1196_s11, %s927_s20  ;;  %p931_p8 = scmp.lt.u32.totalorder %s927_s20, %s1196_s11 }
 0x4bf   :  { %p933_p9 = pnand %p931_p8, %p928_p7 }
 0x4c1   :  { %936 = shalt.err (!%p933_p9)
}
 0x4c2   :  { %664 = dma.vmem_to_hbm [thread:$0]  %s662_s18, 16, %s1196_s11, [#allocation5]  }
 0x4c3   :  { %941 = dma.done.wait [#allocation5], 16  }
 0x4c4   :  { %942 = vsyncadd [#allocation5], 4294967280 }
 0x4c5   :  { %668 = vsyncpa [#allocation4], 1 }
 0x4c6   :  { %669 = vsyncpa [#allocation7], 1 }
 0x4c7   :  { %670 = vsyncpa [#allocation5], 1 }

</bundles_post_ra>
